<compile_context>
chip_gen: v6e
topology: v6e:2x2x1
jax: 0.10.0
libtpu: 0.0.40
codegen_flags: <defaults>
</compile_context>

<pallas_src>
import functools
import math

import jax
import jax.numpy as jnp
from jax.experimental import pallas as pl
from jax.experimental.pallas import tpu as pltpu


def _make_fusion_kernel(num_layers):
    """o = sum_i nw[i] * x_i, f32 accumulation, cast once on the final store."""

    def kernel(nw_ref, *refs):
        # nw_ref : (L,) softmax-normalized weights in SMEM (scalar prefetch)
        # refs   : L input tiles of shape (tm, width), then the output tile
        o_ref = refs[num_layers]
        # Unrolled (L is static & tiny) scalar*vector MAC chain; folded straight
        # into the single store so no full-tile f32 temporary needs to persist.
        acc = nw_ref[0] * refs[0][...].astype(jnp.float32)
        for i in range(1, num_layers):
            acc = acc + nw_ref[i] * refs[i][...].astype(jnp.float32)
        o_ref[...] = acc.astype(o_ref.dtype)

    return kernel


@functools.lru_cache(maxsize=1)
def _vmem_capacity_bytes():
    # Generation-aware: 128 MiB on v5e/v6e, 64 MiB per TensorCore on v7x.
    try:
        return int(pltpu.get_tpu_info().vmem_capacity_bytes)
    except Exception:  # pragma: no cover - conservative fallback
        return 64 << 20


def _choose_width(total):
    # Widest lane-dense slab width that divides the element count (reshape is a
    # free bitcast, no extra HBM traffic).
    for width in (1024, 512, 256, 128):
        if total % width == 0:
            return width
    # Ragged total: widest width that still leaves a reasonable bulk; the
    # (< width) tail is handled by a tiny jnp weighted sum (no padded copies).
    for width in (1024, 512, 256, 128):
        if total // width >= 8:
            return width
    return 128


def _choose_tile_rows(M, width, num_layers, in_itemsize, out_itemsize):
    # Working-set budget ~30% of VMEM (≈19 MiB v7x, ≈38 MiB v5e/v6e); the tile
    # is capped by bytes only -- no fixed row cap, so narrow-width slabs still
    # get large DMA steps.
    budget = max((_vmem_capacity_bytes() * 30) // 100, 8 << 20)
    per_row = width * (num_layers * in_itemsize + out_itemsize)
    tm = budget // (2 * per_row)                 # 2x = double buffering
    tm = max(16, (tm // 16) * 16)                # sublane-safe for f32 & bf16
    if tm >= M:
        # Whole slab fits in one tile within budget: still split so the pipeline
        # has >=2 steps to overlap, and >=4 steps gives both v7x TCs >=2 each.
        if M >= 64:
            tm = ((pl.cdiv(M, 4) + 15) // 16) * 16
        elif M >= 32:
            tm = ((pl.cdiv(M, 2) + 15) // 16) * 16
        else:
            tm = M                               # full-extent row block is legal
    return tm, per_row


def _fused_slab(nw, slabs, out_dtype, in_itemsize):
    L = len(slabs)
    M, width = slabs[0].shape
    out_itemsize = jnp.dtype(out_dtype).itemsize
    tm, per_row = _choose_tile_rows(M, width, L, in_itemsize, out_itemsize)

    work_bytes = 2 * tm * per_row                # double-buffered working set
    vmem_cap = _vmem_capacity_bytes()
    # Leave generous headroom above the working set for Mosaic's elementwise
    # temporaries, but never ask for more than ~80% of physical VMEM.
    vmem_limit = int(min((vmem_cap * 4) // 5,
                         max(32 << 20, 2 * work_bytes + (16 << 20))))

    total = M * width
    cost = pl.CostEstimate(
        flops=2 * L * total,
        transcendentals=0,
        bytes_accessed=total * (L * in_itemsize + out_itemsize),
    )

    return pl.pallas_call(
        _make_fusion_kernel(L),
        out_shape=jax.ShapeDtypeStruct((M, width), out_dtype),
        grid_spec=pltpu.PrefetchScalarGridSpec(
            num_scalar_prefetch=1,               # normalized weights -> SMEM
            grid=(pl.cdiv(M, tm),),
            in_specs=[pl.BlockSpec((tm, width), lambda i, nw_ref: (i, 0))
                      for _ in range(L)],
            out_specs=pl.BlockSpec((tm, width), lambda i, nw_ref: (i, 0)),
        ),
        compiler_params=pltpu.CompilerParams(
            dimension_semantics=("parallel",),
            vmem_limit_bytes=vmem_limit,
        ),
        cost_estimate=cost,
    )(nw, *slabs)


def fixed_layer_fusion(weights, layer_outputs, out_dtype=None):
    """softmax(weights)-weighted sum of L same-shape layer outputs.

    out_dtype=None -> float32 output (matches torch promotion).  Pass e.g.
    jnp.bfloat16 to cut output HBM traffic; accumulation stays f32 in-kernel.
    """
    layer_outputs = [jnp.asarray(l) for l in layer_outputs]
    L = len(layer_outputs)
    orig_shape = layer_outputs[0].shape
    total = math.prod(orig_shape) if orig_shape else 1
    out_dtype = jnp.dtype(jnp.float32 if out_dtype is None else out_dtype)

    # Softmax over the L fusion weights: done once, outside the kernel.
    nw = jax.nn.softmax(jnp.asarray(weights, jnp.float32).reshape(L), axis=0)

    def jnp_weighted_sum(xs):
        acc = nw[0] * xs[0].astype(jnp.float32)
        for i in range(1, L):
            acc = acc + nw[i] * xs[i].astype(jnp.float32)
        return acc.astype(out_dtype)

    if total < 128:
        # Too small for a lane-dense slab; a fused XLA weighted sum is optimal.
        return jnp_weighted_sum(layer_outputs).reshape(orig_shape)

    in_itemsize = max(int(l.dtype.itemsize) for l in layer_outputs)
    width = _choose_width(total)
    rem = total % width
    bulk = total - rem
    M = bulk // width

    flats = [l.reshape(total) for l in layer_outputs]
    if rem:
        slabs = [f[:bulk].reshape(M, width) for f in flats]
    else:
        slabs = [f.reshape(M, width) for f in flats]     # free bitcast

    out_bulk = _fused_slab(nw, slabs, out_dtype, in_itemsize)

    if rem:
        # (< width) ragged tail via a trivial jnp weighted sum -- no zero-pad
        # concat of every input layer.
        tail = jnp_weighted_sum([f[bulk:] for f in flats])
        return jnp.concatenate([out_bulk.reshape(bulk), tail]).reshape(orig_shape)
    return out_bulk.reshape(orig_shape)


if __name__ == "__main__":
    # Deterministic synthetic setup (no checkpoint loading).
    B, C, H, W = 2, 4, 16, 16
    L = 3
    weights = [0.2, 0.5, 0.3]   # fixed learnable weights from __init__ (synthetic)

    key = jax.random.PRNGKey(0)
    keys = jax.random.split(key, L)
    layer_outputs = [jax.random.normal(k, (B, C, H, W), dtype=jnp.float32)
                     for k in keys]

    # Default path: f32 output (matches torch promotion exactly).
    fused = jax.block_until_ready(fixed_layer_fusion(weights, layer_outputs))

    nw = jax.nn.softmax(jnp.asarray(weights, jnp.float32), axis=0)
    ref = sum(w * layer for w, layer in zip(nw, layer_outputs))
    assert fused.shape == (B, C, H, W)
    assert fused.dtype == jnp.float32
    assert jnp.allclose(fused, ref, atol=1e-5, rtol=1e-5), "f32 mismatch vs reference"

    # Opt-in low-HBM-traffic path: bf16 inputs and bf16 output, f32 accumulation.
    lo_bf16 = [l.astype(jnp.bfloat16) for l in layer_outputs]
    fused_bf16 = jax.block_until_ready(
        fixed_layer_fusion(weights, lo_bf16, out_dtype=jnp.bfloat16))
    ref_bf16 = sum(w * l.astype(jnp.float32) for w, l in zip(nw, lo_bf16))
    assert fused_bf16.dtype == jnp.bfloat16
    assert jnp.allclose(fused_bf16.astype(jnp.float32), ref_bf16,
                        atol=3e-2, rtol=3e-2), "bf16 mismatch vs reference"

    print("KERNEL_OK")
</pallas_src>

<mosaic_0001>
module attributes {stable_mosaic.version = 11 : i64} {
  func.func @kernel(%arg0: i32, %arg1: memref<3xf32, #tpu.memory_space<smem>>, %arg2: memref<2x1024xf32, #tpu.memory_space<vmem>>, %arg3: memref<2x1024xf32, #tpu.memory_space<vmem>>, %arg4: memref<2x1024xf32, #tpu.memory_space<vmem>>, %arg5: memref<2x1024xf32, #tpu.memory_space<vmem>>) attributes {dimension_semantics = [#tpu.dimension_semantics<parallel>], iteration_bounds = array<i64: 1>, scalar_prefetch = 1 : i64, scratch_operands = 0 : i64, tpu.core_type = #tpu.core_type<tc>, window_params = [{transform_indices = @transform_0, window_bounds = array<i64: 2, 1024>}, {transform_indices = @transform_1, window_bounds = array<i64: 2, 1024>}, {transform_indices = @transform_2, window_bounds = array<i64: 2, 1024>}, {transform_indices = @transform_3, window_bounds = array<i64: 2, 1024>}]} {
    %c0 = arith.constant 0 : index
    %0 = memref.load %arg1[%c0] : memref<3xf32, #tpu.memory_space<smem>>
    %c0_0 = arith.constant 0 : index
    %c0_1 = arith.constant 0 : index
    %1 = vector.load %arg2[%c0_0, %c0_1] : memref<2x1024xf32, #tpu.memory_space<vmem>>, vector<2x1024xf32>
    %2 = vector.broadcast %0 : f32 to vector<2x1024xf32>
    %3 = arith.mulf %2, %1 : vector<2x1024xf32>
    %c1 = arith.constant 1 : index
    %4 = memref.load %arg1[%c1] : memref<3xf32, #tpu.memory_space<smem>>
    %c0_2 = arith.constant 0 : index
    %c0_3 = arith.constant 0 : index
    %5 = vector.load %arg3[%c0_2, %c0_3] : memref<2x1024xf32, #tpu.memory_space<vmem>>, vector<2x1024xf32>
    %6 = vector.broadcast %4 : f32 to vector<2x1024xf32>
    %7 = arith.mulf %6, %5 : vector<2x1024xf32>
    %8 = arith.addf %3, %7 : vector<2x1024xf32>
    %c2 = arith.constant 2 : index
    %9 = memref.load %arg1[%c2] : memref<3xf32, #tpu.memory_space<smem>>
    %c0_4 = arith.constant 0 : index
    %c0_5 = arith.constant 0 : index
    %10 = vector.load %arg4[%c0_4, %c0_5] : memref<2x1024xf32, #tpu.memory_space<vmem>>, vector<2x1024xf32>
    %11 = vector.broadcast %9 : f32 to vector<2x1024xf32>
    %12 = arith.mulf %11, %10 : vector<2x1024xf32>
    %13 = arith.addf %8, %12 : vector<2x1024xf32>
    %c0_6 = arith.constant 0 : index
    %c0_7 = arith.constant 0 : index
    %14 = vector.load %arg5[%c0_6, %c0_7] : memref<2x1024xf32, #tpu.memory_space<vmem>>, vector<2x1024xf32>
    tpu.vector_store %arg5[%c0_6, %c0_7], %13 {strides = array<i32>} : memref<2x1024xf32, #tpu.memory_space<vmem>>, vector<2x1024xf32>,
    return
  }
  func.func @transform_0(%arg0: i32, %arg1: memref<3xf32, #tpu.memory_space<smem>>) -> (i32, i32) {
    %c0_i32 = arith.constant 0 : i32
    %c0_i32_0 = arith.constant 0 : i32
    return %arg0, %c0_i32 : i32, i32
  }
  func.func @transform_1(%arg0: i32, %arg1: memref<3xf32, #tpu.memory_space<smem>>) -> (i32, i32) {
    %c0_i32 = arith.constant 0 : i32
    %c0_i32_0 = arith.constant 0 : i32
    return %arg0, %c0_i32 : i32, i32
  }
  func.func @transform_2(%arg0: i32, %arg1: memref<3xf32, #tpu.memory_space<smem>>) -> (i32, i32) {
    %c0_i32 = arith.constant 0 : i32
    %c0_i32_0 = arith.constant 0 : i32
    return %arg0, %c0_i32 : i32, i32
  }
  func.func @transform_3(%arg0: i32, %arg1: memref<3xf32, #tpu.memory_space<smem>>) -> (i32, i32) {
    %c0_i32 = arith.constant 0 : i32
    %c0_i32_0 = arith.constant 0 : i32
    return %arg0, %c0_i32 : i32, i32
  }
}

</mosaic_0001>

<bundles_post_ra>
// kernel: tpu_custom_call.1
= control target key start
LH: loop header
LB: loop body
LE: loop exit
PB: predicated region body
PF: predicated region fallthrough
CT: control target
= control target key end

     0   :  { %s198_s15 = smov [#allocation3]   ;;  %s243_s0 = inlined_call_operand.hbm [shape: f32[3], index: 0, kind: input, shape index: {}]   ;;  %s244_s1 = inlined_call_operand.hbm [shape: f32[2,1024], index: 1, kind: input, shape index: {}]   ;;  %s245_s2 = inlined_call_operand.hbm [shape: f32[2,1024], index: 2, kind: input, shape index: {}]   ;;  %s246_s3 = inlined_call_operand.hbm [shape: f32[2,1024], index: 3, kind: input, shape index: {}]   ;;  %s247_s4 = inlined_call_operand.hbm [shape: f32[2,1024], index: 4, kind: output, shape index: {}]  }
   0x1   :  { %10 = dma.hbm_to_smem %s243_s0, 16, %s198_s15, [#allocation2] }
   0x2   :  { %190 = dma.done.wait [#allocation2], 16 }
   0x3   :  { %191 = vsyncadd [#allocation2], 4294967280 }
   0x4   :  { %12 = sfence }
   0x5   :  { %13 = vsyncpa [#allocation5], 0 }
   0x6   :  { %14 = vsyncpa [#allocation8], 0 }
   0x7   :  { %15 = vsyncpa [#allocation6], 0  ;;  %s199_s18 = smov [#allocation7]   ;;  %s200_s20 = smov [#allocation4]  }
   0x8   :  { %s32_s19 = sshll.u32 %s199_s18, 4  ;;  %s22_s21 = sshll.u32 %s200_s20, 4  ;;  %s33_s19 = int_to_ptr.vmem [resolvable:$true] %s32_s19  ;;  %s23_s21 = int_to_ptr.vmem [resolvable:$true] %s22_s21 }
   0x9   :  { %s118_s22 = scalar_lea.vmem %s33_s19, 256  ;;  %p123_p1 = scmp.lt.s32.totalorder %s33_s19, %s33_s19 }
   0xa   :  { %p119_p0 = scmp.ne.s32.totalorder %s33_s19, %s118_s22  ;;  %p124_p2 = scmp.lt.s32.totalorder %s118_s22, %s118_s22 }
   0xc   :  { %p125_p3 = por %p124_p2, %p123_p1 }
   0xe   :  { %p126_p4 = pnand %p125_p3, %p119_p0 }
  0x10   :  { %129 = shalt.err (!%p126_p4)
}
  0x11   :  { %35 = dma.hbm_to_vmem [thread:$0]  %s245_s2, 256, %s33_s19, [#allocation8]  }
  0x12   :  { %s138_s24 = scalar_lea.vmem %s23_s21, 256  ;;  %p143_p6 = scmp.lt.s32.totalorder %s23_s21, %s23_s21 }
  0x13   :  { %p139_p5 = scmp.ne.s32.totalorder %s23_s21, %s138_s24  ;;  %p144_p7 = scmp.lt.s32.totalorder %s138_s24, %s138_s24 }
  0x15   :  { %p145_p8 = por %p144_p7, %p143_p6 }
  0x17   :  { %p146_p9 = pnand %p145_p8, %p139_p5 }
  0x19   :  { %149 = shalt.err (!%p146_p9)
}
  0x1a   :  { %25 = dma.hbm_to_vmem [thread:$0]  %s244_s1, 256, %s23_s21, [#allocation5]  }
  0x1b   :  { %s201_s27 = smov [#allocation9]  }
  0x1c   :  { %s42_s28 = sshll.u32 %s201_s27, 4  ;;  %s43_s28 = int_to_ptr.vmem [resolvable:$true] %s42_s28 }
  0x1d   :  { %s158_s29 = scalar_lea.vmem %s43_s28, 256  ;;  %p163_p11 = scmp.lt.s32.totalorder %s43_s28, %s43_s28 }
  0x1e   :  { %p159_p10 = scmp.ne.s32.totalorder %s43_s28, %s158_s29  ;;  %p164_p12 = scmp.lt.s32.totalorder %s158_s29, %s158_s29 }
  0x20   :  { %p165_p13 = por %p164_p12, %p163_p11 }
  0x22   :  { %p166_p0 = pnand %p165_p13, %p159_p10 }
  0x24   :  { %169 = shalt.err (!%p166_p0)
}
  0x25   :  { %45 = dma.hbm_to_vmem [thread:$0]  %s246_s3, 256, %s43_s28, [#allocation8]  }
  0x26   :  { %192 = dma.done.wait [#allocation5], 256  }
  0x27   :  { %193 = vsyncadd [#allocation5], 4294967040 }
  0x28   :  { %194 = dma.done.wait [#allocation8], 512  }
  0x29   :  { %195 = vsyncadd [#allocation8], 4294966784  ;;  %s55_s5 = sld [smem:[#allocation3]]  ;;  %v56_v0 = vld [vmem:[#allocation4] sm:$0xff]  ;;  %v62_v2 = vld [vmem:[#allocation7] sm:$0xff]  ;;  %s202_s3 = smov [#allocation10]  }
  0x2a   :  { %s95_s1 = sld [smem:[#allocation3 + $0x1]]  ;;  %v70_v3 = vld [vmem:[#allocation9] sm:$0xff]  ;;  %v57_v6 = vld [vmem:[#allocation4 + $0x8] sm:$0xff]  ;;  %v63_v7 = vld [vmem:[#allocation7 + $0x8] sm:$0xff]  ;;  %s85_s7 = sshll.u32 %s202_s3, 4  ;;  %s86_s7 = int_to_ptr.vmem [resolvable:$true] %s85_s7 }
  0x2b   :  { %s96_s6 = sld [smem:[#allocation3 + $0x2]]  ;;  %v71_v8 = vld [vmem:[#allocation9 + $0x8] sm:$0xff]  ;;  %s170_s8 = scalar_lea.vmem %s86_s7, 256 }
  0x2c   :  { %p171_p1 = scmp.ne.s32.totalorder %s86_s7, %s170_s8  ;;  %p175_p2 = scmp.lt.s32.totalorder %s86_s7, %s86_s7 }
  0x2d   :  { %p176_p3 = scmp.lt.s32.totalorder %s170_s8, %s170_s8 }
  0x2f   :  { %v58_v1 = vstv %s55_s5  ;;  %p177_p4 = por %p176_p3, %p175_p2 }
  0x30   :  { %v59_v4 = vmul.f32 %v58_v1, %v56_v0  ;;  %v64_v5 = vstv %s95_s1  ;;  %v60_v11 = vmul.f32 %v58_v1, %v57_v6 }
  0x31   :  { %v65_v9 = vmul.f32 %v64_v5, %v62_v2  ;;  %v72_v10 = vstv %s96_s6  ;;  %v66_v12 = vmul.f32 %v64_v5, %v63_v7  ;;  %p178_p5 = pnand %p177_p4, %p171_p1 }
  0x32   :  { %v73_v13 = vmul.f32 %v72_v10, %v70_v3  ;;  %v74_v14 = vmul.f32 %v72_v10, %v71_v8 }
  0x33   :  { %v67_v15 = vadd.f32 %v65_v9, %v59_v4  ;;  %v68_v16 = vadd.f32 %v66_v12, %v60_v11 }
  0x35   :  { %v75_v17 = vadd.f32 %v73_v13, %v67_v15  ;;  %v76_v18 = vadd.f32 %v74_v14, %v68_v16 }
  0x37   :  { %77 = vst [vmem:[#allocation10] sm:$0xff] %v75_v17  ;;  %78 = vst [vmem:[#allocation10 + $0x8] sm:$0xff] %v76_v18 }
  0x38   :  { %181 = shalt.err (!%p178_p5)
}
  0x39   :  { %88 = dma.vmem_to_hbm [thread:$0]  %s86_s7, 256, %s247_s4, [#allocation6]  }
  0x3a   :  { %196 = dma.done.wait [#allocation6], 256  }
  0x3b   :  { %197 = vsyncadd [#allocation6], 4294967040 }
  0x3c   :  { %92 = vsyncpa [#allocation5], 1 }
  0x3d   :  { %93 = vsyncpa [#allocation8], 1 }
  0x3e   :  { %94 = vsyncpa [#allocation6], 1 }

</bundles_post_ra>
